<compile_context>
chip_gen: v7x
topology: tpu7x:2x2x1
jax: 0.10.0
libtpu: 0.0.40
codegen_flags: <defaults>
</compile_context>

<pallas_src>
import functools

import jax
import jax.numpy as jnp
from jax.experimental import pallas as pl
from jax.experimental.pallas import tpu as pltpu

_LANES = 128
_SUBLANES = 8
_CLAMP = 1000000.0
_TARGET_BLOCK_BYTES = 2 * 1024 * 1024   # ~2 MiB per input block per grid step


def _round_up(x: int, m: int) -> int:
    return ((x + m - 1) // m) * m


def _num_tensorcores() -> int:
    """Best-effort TensorCores-per-chip query (v7x: 2, v5e/v6e: 1)."""
    # TODO(synk): verify in xprof that the size-`num_cores` "parallel" axis
    # really shards across both v7x TensorCores; if it does not, switch that
    # axis to pltpu.CORE_PARALLEL / pl.core_map over create_tensorcore_mesh.
    try:
        info = pltpu.get_tpu_info()
    except Exception:
        return 1
    for attr in ("num_cores", "tensorcore_count", "num_tensorcores",
                 "cores_per_chip", "tensor_cores_per_chip"):
        v = getattr(info, attr, None)
        if isinstance(v, int) and v >= 1:
            return min(v, 2)
    return 1


def _fold_to_sublane_tile(sq: jax.Array, block_rows: int) -> jax.Array:
    """Fold (block_rows, 128) partial squares down to one (8, 128) tile."""
    g = block_rows // _SUBLANES
    x = sq.reshape(g, _SUBLANES, _LANES)
    if g & (g - 1):                     # not a power of two: compiler reduce
        return jnp.sum(x, axis=0)
    while x.shape[0] > 1:               # pairwise (tree) fold, short dep chain
        half = x.shape[0] // 2
        x = x[:half] + x[half:]
    return x.reshape(_SUBLANES, _LANES)


def _mse_kernel(yp_ref, yt_ref, out_ref, acc_ref, *,
                n_elements, block_rows, blocks_per_core, num_blocks,
                tail_needed, overshoot_possible):
    p = pl.program_id(0)          # parallel chunk (maps to a TensorCore on v7x)
    s = pl.program_id(1)          # reduction step within the chunk
    logical_block = p * blocks_per_core + s

    @pl.when(s == 0)
    def _init():
        acc_ref[...] = jnp.zeros_like(acc_ref)      # one (8,128) vreg only

    def _compute():
        # Stream native dtype from HBM; upcast to f32 in VMEM.
        yp = yp_ref[...].astype(jnp.float32)
        yt = yt_ref[...].astype(jnp.float32)
        # torch.nan_to_num(nan=0.0) then torch.clamp(+/-1e6).  Clamp happens
        # BEFORE any tail masking so garbage data read in the ragged last
        # block can never leak NaN/inf into the accumulator.
        yp = jnp.clip(jnp.where(jnp.isnan(yp), jnp.float32(0.0), yp),
                      -_CLAMP, _CLAMP)
        yt = jnp.clip(jnp.where(jnp.isnan(yt), jnp.float32(0.0), yt),
                      -_CLAMP, _CLAMP)
        d = yp - yt
        sq = d * d

        if tail_needed:
            @pl.when(logical_block == num_blocks - 1)
            def _tail():
                row = jax.lax.broadcasted_iota(jnp.int32, (block_rows, _LANES), 0)
                lane = jax.lax.broadcasted_iota(jnp.int32, (block_rows, _LANES), 1)
                idx = (logical_block * block_rows + row) * _LANES + lane
                masked = jnp.where(idx < n_elements, sq, jnp.float32(0.0))
                acc_ref[...] += _fold_to_sublane_tile(masked, block_rows)

            @pl.when(logical_block < num_blocks - 1)
            def _interior():
                acc_ref[...] += _fold_to_sublane_tile(sq, block_rows)
        else:
            acc_ref[...] += _fold_to_sublane_tile(sq, block_rows)

    if overshoot_possible:
        # Clamped re-read block: its DMA still happens (index_map clamp), but
        # the whole nan/clip/sub/mul/fold pass is skipped.
        pl.when(logical_block < num_blocks)(_compute)
    else:
        _compute()

    # Epilogue (once per parallel chunk): emit the lane-dense, fully aligned
    # (8,128) partial-sum block; final tiny reduction + divide is in the wrapper.
    @pl.when(s == pl.num_programs(1) - 1)
    def _finalize():
        out_ref[...] = acc_ref[...]


def mse_loss(y_pred: jax.Array, y_true: jax.Array) -> jax.Array:
    """MSE loss matching the PyTorch MSE module semantics (mean reduction)."""
    assert y_pred.shape == y_true.shape, "y_pred / y_true must have same shape"
    n_elements = int(y_pred.size)
    assert n_elements > 0

    # Keep native dtype; flatten (zero-copy reshape for contiguous inputs).
    yp = jnp.ravel(y_pred)
    yt = jnp.ravel(y_true)

    # Lane-dense (rows, 128) slab.  A pad copy only happens when the element
    # count is not a multiple of 128 (never for the example shape).
    rem = n_elements % _LANES
    if rem:
        # TODO(synk): the <128-element ragged case still pays one jnp.pad copy;
        # a manual-DMA path over the flat array would remove it entirely.
        yp = jnp.pad(yp, (0, _LANES - rem))
        yt = jnp.pad(yt, (0, _LANES - rem))
    rows = (n_elements + _LANES - 1) // _LANES
    yp2 = yp.reshape(rows, _LANES)
    yt2 = yt.reshape(rows, _LANES)

    # dtype-aware block sizing: ~2 MiB per input block, rows rounded to the
    # native sublane packing (8 for 32-bit, 16 for 16-bit, 32 for 8-bit).
    itemsize = int(jnp.dtype(yp2.dtype).itemsize)
    packing = max(1, 4 // max(1, itemsize))
    sublane_mult = _SUBLANES * packing
    max_block_rows = max(sublane_mult, _TARGET_BLOCK_BYTES // (_LANES * itemsize))
    block_rows = min(max_block_rows, _round_up(rows, sublane_mult))
    num_blocks = pl.cdiv(rows, block_rows)

    # One chunk per TensorCore (v7x: 2); single-TC chips never pay for a split.
    num_cores = max(1, min(_num_tensorcores(), num_blocks))
    blocks_per_core = pl.cdiv(num_blocks, num_cores)
    last_block = num_blocks - 1
    tail_needed = (num_blocks * block_rows * _LANES) != n_elements
    overshoot_possible = num_cores * blocks_per_core > num_blocks

    def in_map(p, s):
        # Clamp so an overshoot block re-reads the last valid block; its
        # compute is skipped entirely inside the kernel.
        return (jnp.minimum(p * blocks_per_core + s, last_block), 0)

    kernel = functools.partial(
        _mse_kernel,
        n_elements=n_elements,
        block_rows=block_rows,
        blocks_per_core=blocks_per_core,
        num_blocks=num_blocks,
        tail_needed=tail_needed,
        overshoot_possible=overshoot_possible,
    )

    in_bytes = yp2.size * itemsize + yt2.size * itemsize
    out_bytes = num_cores * _SUBLANES * _LANES * 4
    cost = pl.CostEstimate(
        flops=8 * n_elements, transcendentals=0,
        bytes_accessed=in_bytes + out_bytes)

    partials = pl.pallas_call(
        kernel,
        out_shape=jax.ShapeDtypeStruct((num_cores * _SUBLANES, _LANES), jnp.float32),
        grid_spec=pltpu.PrefetchScalarGridSpec(
            num_scalar_prefetch=0,
            grid=(num_cores, blocks_per_core),
            in_specs=[
                # TODO(synk): on v7x, sweep pipeline_mode=pl.Buffered(3) here.
                pl.BlockSpec((block_rows, _LANES), in_map),
                pl.BlockSpec((block_rows, _LANES), in_map),
            ],
            out_specs=pl.BlockSpec((_SUBLANES, _LANES), lambda p, s: (p, 0)),
            scratch_shapes=[pltpu.VMEM((_SUBLANES, _LANES), jnp.float32)],
        ),
        compiler_params=pltpu.CompilerParams(
            dimension_semantics=("parallel", "arbitrary"),
            vmem_limit_bytes=32 * 1024 * 1024,
        ),
        cost_estimate=cost,
    )(yp2, yt2)

    # TODO(synk): the PyTorch module prints a host-side warning when NaNs are
    # detected; the kernel silently applies nan_to_num instead (no print).
    return jnp.sum(partials) / jnp.float32(n_elements)


if __name__ == "__main__":
    key = jax.random.PRNGKey(0)
    k1, k2 = jax.random.split(key)
    shape = (2, 4, 16, 16)
    y_pred = jax.random.normal(k1, shape, dtype=jnp.float32)
    y_true = jax.random.normal(k2, shape, dtype=jnp.float32)

    loss = mse_loss(y_pred, y_true)
    jax.block_until_ready(loss)

    # Reference check (plain JAX) to make sure semantics match.
    ref = jnp.mean(
        (jnp.clip(jnp.nan_to_num(y_pred), -1e6, 1e6)
         - jnp.clip(jnp.nan_to_num(y_true), -1e6, 1e6)) ** 2
    )
    assert jnp.allclose(loss, ref, rtol=1e-5, atol=1e-6), (loss, ref)

    # NaN-handling check (same shapes / same kernel configuration).
    y_pred_nan = y_pred.at[0, 0, 0, 0].set(jnp.nan)
    loss_nan = mse_loss(y_pred_nan, y_true)
    jax.block_until_ready(loss_nan)
    ref_nan = jnp.mean(
        (jnp.clip(jnp.nan_to_num(y_pred_nan), -1e6, 1e6)
         - jnp.clip(jnp.nan_to_num(y_true), -1e6, 1e6)) ** 2
    )
    assert jnp.allclose(loss_nan, ref_nan, rtol=1e-5, atol=1e-6), (loss_nan, ref_nan)

    print("KERNEL_OK")
</pallas_src>

<mosaic_0001>
module attributes {stable_mosaic.version = 11 : i64} {
  func.func @_mse_kernel(%arg0: i32, %arg1: i32, %arg2: memref<16x128xf32, #tpu.memory_space<vmem>>, %arg3: memref<16x128xf32, #tpu.memory_space<vmem>>, %arg4: memref<8x128xf32, #tpu.memory_space<vmem>>, %arg5: memref<8x128xf32, #tpu.memory_space<vmem>>) attributes {dimension_semantics = [#tpu.dimension_semantics<parallel>, #tpu.dimension_semantics<arbitrary>], iteration_bounds = array<i64: 1, 1>, scalar_prefetch = 0 : i64, scratch_operands = 1 : i64, tpu.core_type = #tpu.core_type<tc>, window_params = [{transform_indices = @transform_0, window_bounds = array<i64: 16, 128>}, {transform_indices = @transform_1, window_bounds = array<i64: 16, 128>}, {transform_indices = @transform_2, window_bounds = array<i64: 8, 128>}]} {
    %c0_i32 = arith.constant 0 : i32
    %0 = arith.cmpi eq, %arg1, %c0_i32 : i32
    %1 = arith.extui %0 : i1 to i32
    %c0_i32_0 = arith.constant 0 : i32
    %2 = arith.cmpi ne, %1, %c0_i32_0 : i32
    scf.if %2 {
      %cst_15 = arith.constant 0.000000e+00 : f32
      %32 = vector.broadcast %cst_15 : f32 to vector<8x128xf32>
      %c0_16 = arith.constant 0 : index
      %c0_17 = arith.constant 0 : index
      %33 = vector.load %arg5[%c0_16, %c0_17] : memref<8x128xf32, #tpu.memory_space<vmem>>, vector<8x128xf32>
      tpu.vector_store %arg5[%c0_16, %c0_17], %32 {strides = array<i32>} : memref<8x128xf32, #tpu.memory_space<vmem>>, vector<8x128xf32>,
    } else {
    }
    %c0 = arith.constant 0 : index
    %c0_1 = arith.constant 0 : index
    %3 = vector.load %arg2[%c0, %c0_1] : memref<16x128xf32, #tpu.memory_space<vmem>>, vector<16x128xf32>
    %c0_2 = arith.constant 0 : index
    %c0_3 = arith.constant 0 : index
    %4 = vector.load %arg3[%c0_2, %c0_3] : memref<16x128xf32, #tpu.memory_space<vmem>>, vector<16x128xf32>
    %5 = arith.cmpf one, %3, %3 : vector<16x128xf32>
    %cst = arith.constant 0.000000e+00 : f32
    %6 = vector.broadcast %cst : f32 to vector<16x128xf32>
    %7 = arith.select %5, %6, %3 : vector<16x128xi1>, vector<16x128xf32>
    %cst_4 = arith.constant -1.000000e+06 : f32
    %cst_5 = arith.constant 1.000000e+06 : f32
    %8 = vector.broadcast %cst_4 : f32 to vector<16x128xf32>
    %9 = arith.maximumf %8, %7 : vector<16x128xf32>
    %10 = vector.broadcast %cst_5 : f32 to vector<16x128xf32>
    %11 = arith.minimumf %10, %9 : vector<16x128xf32>
    %12 = arith.cmpf one, %4, %4 : vector<16x128xf32>
    %cst_6 = arith.constant 0.000000e+00 : f32
    %13 = vector.broadcast %cst_6 : f32 to vector<16x128xf32>
    %14 = arith.select %12, %13, %4 : vector<16x128xi1>, vector<16x128xf32>
    %cst_7 = arith.constant -1.000000e+06 : f32
    %cst_8 = arith.constant 1.000000e+06 : f32
    %15 = vector.broadcast %cst_7 : f32 to vector<16x128xf32>
    %16 = arith.maximumf %15, %14 : vector<16x128xf32>
    %17 = vector.broadcast %cst_8 : f32 to vector<16x128xf32>
    %18 = arith.minimumf %17, %16 : vector<16x128xf32>
    %19 = arith.subf %11, %18 : vector<16x128xf32>
    %20 = arith.mulf %19, %19 : vector<16x128xf32>
    %c0_9 = arith.constant 0 : index
    %c0_10 = arith.constant 0 : index
    %21 = vector.load %arg5[%c0_9, %c0_10] : memref<8x128xf32, #tpu.memory_space<vmem>>, vector<8x128xf32>
    %22 = vector.shape_cast %20 : vector<16x128xf32> to vector<2x8x128xf32>
    %23 = vector.extract_strided_slice %22 {offsets = [0, 0, 0], sizes = [1, 8, 128], strides = [1, 1, 1]} : vector<2x8x128xf32> to vector<1x8x128xf32>
    %24 = vector.extract_strided_slice %22 {offsets = [1, 0, 0], sizes = [1, 8, 128], strides = [1, 1, 1]} : vector<2x8x128xf32> to vector<1x8x128xf32>
    %25 = arith.addf %23, %24 : vector<1x8x128xf32>
    %26 = vector.shape_cast %25 : vector<1x8x128xf32> to vector<8x128xf32>
    %27 = arith.addf %21, %26 : vector<8x128xf32>
    %c0_11 = arith.constant 0 : index
    %c0_12 = arith.constant 0 : index
    %28 = vector.load %arg5[%c0_11, %c0_12] : memref<8x128xf32, #tpu.memory_space<vmem>>, vector<8x128xf32>
    tpu.vector_store %arg5[%c0_11, %c0_12], %27 {strides = array<i32>} : memref<8x128xf32, #tpu.memory_space<vmem>>, vector<8x128xf32>,
    %c0_i32_13 = arith.constant 0 : i32
    %29 = arith.cmpi eq, %arg1, %c0_i32_13 : i32
    %30 = arith.extui %29 : i1 to i32
    %c0_i32_14 = arith.constant 0 : i32
    %31 = arith.cmpi ne, %30, %c0_i32_14 : i32
    scf.if %31 {
      %c0_15 = arith.constant 0 : index
      %c0_16 = arith.constant 0 : index
      %32 = vector.load %arg5[%c0_15, %c0_16] : memref<8x128xf32, #tpu.memory_space<vmem>>, vector<8x128xf32>
      %c0_17 = arith.constant 0 : index
      %c0_18 = arith.constant 0 : index
      %33 = vector.load %arg4[%c0_17, %c0_18] : memref<8x128xf32, #tpu.memory_space<vmem>>, vector<8x128xf32>
      tpu.vector_store %arg4[%c0_17, %c0_18], %32 {strides = array<i32>} : memref<8x128xf32, #tpu.memory_space<vmem>>, vector<8x128xf32>,
    } else {
    }
    return
  }
  func.func @transform_0(%arg0: i32, %arg1: i32) -> (i32, i32) {
    %c1_i32 = arith.constant 1 : i32
    %0 = arith.muli %arg0, %c1_i32 : i32
    %1 = arith.addi %0, %arg1 : i32
    %c0_i32 = arith.constant 0 : i32
    %2 = arith.minsi %1, %c0_i32 : i32
    %c0_i32_0 = arith.constant 0 : i32
    %c0_i32_1 = arith.constant 0 : i32
    return %2, %c0_i32_0 : i32, i32
  }
  func.func @transform_1(%arg0: i32, %arg1: i32) -> (i32, i32) {
    %c1_i32 = arith.constant 1 : i32
    %0 = arith.muli %arg0, %c1_i32 : i32
    %1 = arith.addi %0, %arg1 : i32
    %c0_i32 = arith.constant 0 : i32
    %2 = arith.minsi %1, %c0_i32 : i32
    %c0_i32_0 = arith.constant 0 : i32
    %c0_i32_1 = arith.constant 0 : i32
    return %2, %c0_i32_0 : i32, i32
  }
  func.func @transform_2(%arg0: i32, %arg1: i32) -> (i32, i32) {
    %c0_i32 = arith.constant 0 : i32
    %c0_i32_0 = arith.constant 0 : i32
    return %arg0, %c0_i32 : i32, i32
  }
}

</mosaic_0001>

<bundles_post_ra>
// kernel: tpu_custom_call.1
= control target key start
LH: loop header
LB: loop body
LE: loop exit
PB: predicated region body
PF: predicated region fallthrough
CT: control target
= control target key end

     0   :  { %7 = vsyncpa [#allocation4], 0  ;;  %s255_s0 = inlined_call_operand.hbm [shape: f32[16,128], index: 0, kind: input, shape index: {}]   ;;  %s256_s1 = inlined_call_operand.hbm [shape: f32[16,128], index: 1, kind: input, shape index: {}]   ;;  %s257_s2 = inlined_call_operand.hbm [shape: f32[8,128], index: 2, kind: output, shape index: {}]  }
   0x1   :  { %8 = vsyncpa [#allocation7], 0 }
   0x2   :  { %9 = vsyncpa [#allocation5], 0  ;;  %s199_s9 = smov [#allocation3]   ;;  %s127_s13 = scalar_lea.hbm %s255_s0, 256 }
   0x3   :  { %s21_s10 = sshll.u32 %s199_s9, 4  ;;  %p128_p0 = scmp.ne.s32.totalorder %s255_s0, %s127_s13  ;;  %s22_s10 = int_to_ptr.vmem [resolvable:$true] %s21_s10 }
   0x4   :  { %p131_p1 = scmp.lt.u32.totalorder %s127_s13, %s255_s0 }
   0x6   :  { %p133_p2 = pnand %p131_p1, %p128_p0 }
   0x8   :  { %136 = shalt.err (!%p133_p2)
}
   0x9   :  { %s137_s18 = scalar_lea.vmem %s22_s10, 256  ;;  %p142_p4 = scmp.lt.s32.totalorder %s22_s10, %s22_s10 }
   0xa   :  { %p138_p3 = scmp.ne.s32.totalorder %s22_s10, %s137_s18  ;;  %p143_p5 = scmp.lt.s32.totalorder %s137_s18, %s137_s18 }
   0xc   :  { %p144_p6 = por %p143_p5, %p142_p4 }
   0xe   :  { %p145_p7 = pnand %p144_p6, %p138_p3 }
  0x10   :  { %148 = shalt.err (!%p145_p7)
}
  0x11   :  { %s200_s19 = smov 128   ;;  %s201_s20 = smov 8  }
  0x12   :  { %27 = dma.hbm_to_vmem [thread:$0]  %s255_s0, 256, %s22_s10, [#allocation4], %s200_s19, %s200_s19, %s201_s20  }
  0x13   :  { %s202_s23 = smov [#allocation6]   ;;  %s149_s27 = scalar_lea.hbm %s256_s1, 256 }
  0x14   :  { %s39_s24 = sshll.u32 %s202_s23, 4  ;;  %p150_p8 = scmp.ne.s32.totalorder %s256_s1, %s149_s27  ;;  %s40_s24 = int_to_ptr.vmem [resolvable:$true] %s39_s24 }
  0x15   :  { %p153_p9 = scmp.lt.u32.totalorder %s149_s27, %s256_s1 }
  0x17   :  { %p155_p10 = pnand %p153_p9, %p150_p8 }
  0x19   :  { %158 = shalt.err (!%p155_p10)
}
  0x1a   :  { %s159_s4 = scalar_lea.vmem %s40_s24, 256  ;;  %p164_p12 = scmp.lt.s32.totalorder %s40_s24, %s40_s24 }
  0x1b   :  { %p160_p11 = scmp.ne.s32.totalorder %s40_s24, %s159_s4  ;;  %p165_p13 = scmp.lt.s32.totalorder %s159_s4, %s159_s4 }
  0x1d   :  { %p166_p0 = por %p165_p13, %p164_p12 }
  0x1f   :  { %p167_p1 = pnand %p166_p0, %p160_p11 }
  0x21   :  { %170 = shalt.err (!%p167_p1)
}
  0x22   :  { %45 = dma.hbm_to_vmem [thread:$0]  %s256_s1, 256, %s40_s24, [#allocation7], %s200_s19, %s200_s19, %s201_s20  }
  0x23   :  { %193 = dma.done.wait [#allocation4], 256  }
  0x24   :  { %194 = vsyncadd [#allocation4], 4294967040 }
  0x25   :  { %195 = dma.done.wait [#allocation7], 256  }
  0x26   :  { %196 = vsyncadd [#allocation7], 4294967040  ;;  %v65_v0 = vld [vmem:[#allocation3] sm:$0xff]  ;;  %v66_v1 = vld [vmem:[#allocation3 + $0x8] sm:$0xff]  ;;  %s203_s1 = smov [#allocation8]  }
  0x27   :  { %v67_v2 = vld [vmem:[#allocation6] sm:$0xff]  ;;  %v68_v3 = vld [vmem:[#allocation6 + $0x8] sm:$0xff]  ;;  %vm69_vm0 = vcmp.ne.f32.partialorder %v65_v0, %v65_v0  ;;  %vm70_vm1 = vcmp.ne.f32.partialorder %v66_v1, %v66_v1  ;;  %s104_s6 = sshll.u32 %s203_s1, 4  ;;  %s105_s6 = int_to_ptr.vmem [resolvable:$true] %s104_s6 }
  0x28   :  { %vm77_vm2 = vcmp.ne.f32.partialorder %v67_v2, %v67_v2  ;;  %v71_v4 = vsel %vm69_vm0, 0.0, %v65_v0  ;;  %v72_v5 = vsel %vm70_vm1, 0.0, %v66_v1  ;;  %vm78_vm3 = vcmp.ne.f32.partialorder %v68_v3, %v68_v3  ;;  %s171_s7 = scalar_lea.vmem %s105_s6, 128  ;;  %p176_p3 = scmp.lt.s32.totalorder %s105_s6, %s105_s6 }
  0x29   :  { %v79_v6 = vsel %vm77_vm2, 0.0, %v67_v2  ;;  %v118_v7 = vclamps-f32 %v71_v4, 1000000.0  ;;  %v119_v8 = vclamps-f32 %v72_v5, 1000000.0  ;;  %v80_v9 = vsel %vm78_vm3, 0.0, %v68_v3  ;;  %p172_p2 = scmp.ne.s32.totalorder %s105_s6, %s171_s7  ;;  %p177_p4 = scmp.lt.s32.totalorder %s171_s7, %s171_s7 }
  0x2a   :  { %v120_v10 = vclamps-f32 %v79_v6, 1000000.0  ;;  %v121_v11 = vclamps-f32 %v80_v9, 1000000.0 }
  0x2b   :  { %p178_p5 = por %p177_p4, %p176_p3 }
  0x2c   :  { %v85_v12 = vsub.f32 %v118_v7, %v120_v10  ;;  %v86_v13 = vsub.f32 %v119_v8, %v121_v11 }
  0x2d   :  { %p179_p6 = pnand %p178_p5, %p172_p2 }
  0x2e   :  { %v87_v14 = vmul.f32 %v85_v12, %v85_v12  ;;  %v88_v15 = vmul.f32 %v86_v13, %v86_v13 }
  0x30   :  { %v90_v16 = vadd.f32 %v88_v15, %v87_v14 }
  0x32   :  { %97 = vst [vmem:[#allocation8] sm:$0xff] %v90_v16 }
  0x33   :  { %182 = shalt.err (!%p179_p6)
}
  0x34   :  { %s183_s10 = scalar_lea.hbm %s257_s2, 128 }
  0x35   :  { %p184_p7 = scmp.ne.s32.totalorder %s257_s2, %s183_s10  ;;  %p187_p8 = scmp.lt.u32.totalorder %s183_s10, %s257_s2 }
  0x37   :  { %p189_p9 = pnand %p187_p8, %p184_p7 }
  0x39   :  { %192 = shalt.err (!%p189_p9)
}
  0x3a   :  { %107 = dma.vmem_to_hbm [thread:$0]  %s105_s6, 128, %s257_s2, [#allocation5]  }
  0x3b   :  { %197 = dma.done.wait [#allocation5], 128  }
  0x3c   :  { %198 = vsyncadd [#allocation5], 4294967168 }
  0x3d   :  { %111 = vsyncpa [#allocation4], 1 }
  0x3e   :  { %112 = vsyncpa [#allocation7], 1 }
  0x3f   :  { %113 = vsyncpa [#allocation5], 1 }

</bundles_post_ra>
